<compile_context>
chip_gen: v7x
topology: tpu7x:2x2x1
jax: 0.10.0
libtpu: 0.0.40
codegen_flags: <defaults>
</compile_context>

<pallas_src>
from functools import partial

import jax
import jax.numpy as jnp
from jax.experimental import pallas as pl
from jax.experimental.pallas import tpu as pltpu


def local_attention_kernel(x_ref, wqkv_ref, wo_ref, bo_ref, o_ref, acc_ref,
                           *, n, dim_head):
    """One grid step = (batch tile i, head h). Heads axis is a reduction."""
    h = pl.program_id(1)

    @pl.when(h == 0)
    def _():
        acc_ref[...] = jnp.zeros_like(acc_ref)

    rows, _ = x_ref.shape              # rows = batch_tile * n
    bt = rows // n

    x = x_ref[...]                     # bf16 (cast on the host)

    # Fused per-head projection: one MXU matmul with N = 3*dim_head lanes.
    qkv = jnp.dot(x, wqkv_ref[...], preferred_element_type=jnp.float32)
    q = qkv[:, :dim_head]
    k = qkv[:, dim_head:2 * dim_head]
    v = qkv[:, 2 * dim_head:]

    qb = q.reshape(bt, n, dim_head).astype(jnp.bfloat16)
    kb = k.reshape(bt, n, dim_head).astype(jnp.bfloat16)
    vb = v.reshape(bt, n, dim_head).astype(jnp.bfloat16)

    # Scores + softmax. Elementwise math stays f32 (v5e has no bf16 VPU/EUP);
    # operands are cast to bf16 only right at the MXU boundary.
    sim = jnp.einsum('bid,bjd->bij', qb, kb,
                     preferred_element_type=jnp.float32)        # (bt, n, n)
    sim = sim - jnp.max(sim, axis=-1, keepdims=True)
    p = jnp.exp(sim)
    l = jnp.sum(p, axis=-1, keepdims=True)                      # (bt, n, 1)

    o_h = jnp.einsum('bij,bjd->bid', p.astype(jnp.bfloat16), vb,
                     preferred_element_type=jnp.float32)        # (bt, n, dim_head)
    # Normalize the small (n, dim_head) head output instead of the (n, n)
    # probabilities; the approximate reciprocal runs on the EUP slot.
    o_h = o_h * pl.reciprocal(l, approx=True)

    # out @ Wo == sum_h o_h @ Wo[h]: per-head partial output projection,
    # accumulated in f32 across the heads grid axis.
    # TODO(synk): for dim_head >= 64 a single fused (rows, inner) @ (inner, dim)
    # projection (heads concatenated along lanes) fills the MXU K dim better;
    # with heads on the grid and dim_head = 16 the accumulation form wins.
    acc_ref[...] += jnp.dot(o_h.reshape(rows, dim_head).astype(jnp.bfloat16),
                            wo_ref[...], preferred_element_type=jnp.float32)

    @pl.when(h == pl.num_programs(1) - 1)
    def _():
        o_ref[...] = (acc_ref[...] + bo_ref[...]).astype(o_ref.dtype)


def _vmem_limit_bytes():
    """Generation-aware scoped-VMEM limit (v5e/v6e: 128 MiB, v7x: 64 MiB)."""
    try:
        cap = pltpu.get_tpu_info().vmem_capacity_bytes
    except Exception:
        cap = 64 * 1024 * 1024          # conservative: v7x per-TensorCore VMEM
    return min(int(cap * 0.8), 112 * 1024 * 1024)


def _pick_batch_tile(b, n, dim, dim_head, out_itemsize, vmem_budget):
    """Derive batch_tile from a VMEM budget (one head resident at a time)."""
    per_b = (n * n * (4 + 4 + 2)                    # sim f32 + p f32 + p bf16
             + 3 * n * dim_head * (4 + 2)           # q/k/v f32 + bf16 copies
             + n * dim * (2 * 2 + 4 + 2 * out_itemsize))  # x bf16 (x2) + acc f32 + out (x2)
    fixed = 2 * 2 * (dim * 3 * dim_head + dim_head * dim) * 2 + 2 * 4 * dim
    bt = max(1, (vmem_budget - fixed) // max(per_b, 1))
    bt = min(bt, max(1, 512 // max(n, 1)))          # ~512 MXU M rows is plenty
    bt = min(bt, b)
    if b >= 2:
        bt = min(bt, b // 2)                        # >= 2 grid steps: v7x dual-TC
    return max(1, int(bt))


def local_attention(x, wq, wkv, wo, bo, *, heads, dim_head, batch_tile=None):
    b, n, dim = x.shape
    inner = heads * dim_head
    scale = dim_head ** (-0.5)

    # One-off host-side parameter prep:
    #   * fold the 1/sqrt(dim_head) scale into Wq,
    #   * fuse [Wq | Wk | Wv] along the output (lane) axis with a leading head
    #     axis -> (heads, dim, 3*dim_head) (one projection matmul per head),
    #   * bf16 MXU operands (accumulation stays f32 in-kernel).
    wq_h = (wq * scale).reshape(dim, heads, dim_head)
    wk_h = wkv[:, :inner].reshape(dim, heads, dim_head)
    wv_h = wkv[:, inner:].reshape(dim, heads, dim_head)
    wqkv_h = (jnp.concatenate([wq_h, wk_h, wv_h], axis=-1)      # (dim, heads, 3*dh)
              .transpose(1, 0, 2).astype(jnp.bfloat16))         # (heads, dim, 3*dh)
    wo_h = wo.reshape(heads, dim_head, dim).astype(jnp.bfloat16)
    bo2d = bo.reshape(1, dim).astype(jnp.float32)

    vmem_limit = _vmem_limit_bytes()
    if batch_tile is None:
        batch_tile = _pick_batch_tile(b, n, dim, dim_head, x.dtype.itemsize,
                                      vmem_limit // 2)
    # The in-kernel (rows, d) <-> (bt, n, d) reshapes are only free when n is a
    # multiple of the f32 sublane count (8); otherwise keep bt = 1.
    if n % 8 != 0:
        batch_tile = 1
    while b % batch_tile:
        batch_tile -= 1
    rows = batch_tile * n
    if rows % 8 != 0 and rows != b * n:
        # BlockSpec requires the second-to-last block dim to be a multiple of 8
        # or the full extent; fall back to one whole-batch tile (always legal).
        batch_tile, rows = b, b * n
    grid_b = b // batch_tile

    # Lane-dense bf16 input slab: halves the HBM->VMEM input DMA vs f32.
    x2 = x.reshape(b * n, dim).astype(jnp.bfloat16)

    kernel = partial(local_attention_kernel, n=n, dim_head=dim_head)

    cost = pl.CostEstimate(
        flops=(2 * b * n * dim * 3 * inner          # fused QKV projection
               + 4 * b * heads * n * n * dim_head   # scores + attn @ v
               + 2 * b * n * inner * dim),          # output projection
        transcendentals=b * heads * n * n,          # softmax exp
        bytes_accessed=(x2.size * 2
                        + 2 * grid_b * (wqkv_h.size + wo_h.size)
                        + 4 * bo2d.size
                        + b * n * dim * x.dtype.itemsize),
    )

    out2 = pl.pallas_call(
        kernel,
        out_shape=jax.ShapeDtypeStruct((b * n, dim), x.dtype),
        grid_spec=pltpu.PrefetchScalarGridSpec(
            num_scalar_prefetch=0,
            grid=(grid_b, heads),
            in_specs=[
                # x tile: constant across the heads axis -> revisited, no re-DMA.
                pl.BlockSpec((rows, dim), lambda i, h: (i, 0)),
                # Per-head fused QKV / output-projection weights: the block
                # index varies with h, so the default double buffering streams
                # the next head's weights under this head's compute (a
                # pl.Buffered(1) hint only pays off for constant-index blocks,
                # which is now just the tiny bias — not worth it).
                pl.BlockSpec((None, dim, 3 * dim_head), lambda i, h: (h, 0, 0)),
                pl.BlockSpec((None, dim_head, dim), lambda i, h: (h, 0, 0)),
                pl.BlockSpec((1, dim), lambda i, h: (0, 0)),                 # bias
            ],
            out_specs=pl.BlockSpec((rows, dim), lambda i, h: (i, 0)),
            scratch_shapes=[pltpu.VMEM((rows, dim), jnp.float32)],           # acc
        ),
        compiler_params=pltpu.CompilerParams(
            dimension_semantics=("parallel", "arbitrary"),   # batch || , heads = reduction
            vmem_limit_bytes=vmem_limit,
        ),
        cost_estimate=cost,
    )(x2, wqkv_h, wo_h, bo2d)

    return out2.reshape(b, n, dim)


def local_attention_ref(x, wq, wkv, wo, bo, *, heads, dim_head):
    """Pure-JAX f32 reference mirroring the PyTorch forward."""
    b, n, dim = x.shape
    inner = heads * dim_head
    scale = dim_head ** (-0.5)
    q = x @ wq
    kv = x @ wkv
    k, v = kv[..., :inner], kv[..., inner:]

    def split(t):  # 'b i (h d) -> b h i d'
        return t.reshape(b, n, heads, dim_head).transpose(0, 2, 1, 3)

    q, k, v = split(q) * scale, split(k), split(v)
    sim = jnp.einsum('bhid,bhjd->bhij', q, k)
    attn = jax.nn.softmax(sim, axis=-1)
    out = jnp.einsum('bhij,bhjd->bhid', attn, v)
    out = out.transpose(0, 2, 1, 3).reshape(b, n, inner)
    return out @ wo + bo


if __name__ == "__main__":
    # module hyper-params (args.hcam.*)
    dim, heads, dim_head = 32, 4, 16
    inner = heads * dim_head
    batch, seq = 2, 8

    key = jax.random.PRNGKey(0)
    kx, kq, kkv, kwo, kbo = jax.random.split(key, 5)

    x = jax.random.normal(kx, (batch, seq, dim), dtype=jnp.float32)
    # deterministic synthetic parameters (shapes follow the module's __init__)
    wq = jax.random.normal(kq, (dim, inner), dtype=jnp.float32) * 0.05
    wkv = jax.random.normal(kkv, (dim, 2 * inner), dtype=jnp.float32) * 0.05
    wo = jax.random.normal(kwo, (inner, dim), dtype=jnp.float32) * 0.05
    bo = jax.random.normal(kbo, (dim,), dtype=jnp.float32) * 0.05

    out = local_attention(x, wq, wkv, wo, bo, heads=heads, dim_head=dim_head)
    out = jax.block_until_ready(out)

    ref = local_attention_ref(x, wq, wkv, wo, bo, heads=heads, dim_head=dim_head)
    assert out.shape == (batch, seq, dim)
    # Tolerance accounts for bf16 MXU operands + approx reciprocal (f32 accum).
    assert jnp.allclose(out, ref, atol=1e-2, rtol=1e-2), "mismatch vs reference"

    print("KERNEL_OK")
</pallas_src>

<mosaic_0001>
module attributes {stable_mosaic.version = 11 : i64} {
  func.func @local_attention_kernel(%arg0: i32, %arg1: i32, %arg2: memref<8x32xbf16, #tpu.memory_space<vmem>>, %arg3: memref<1x32x48xbf16, #tpu.memory_space<vmem>>, %arg4: memref<1x16x32xbf16, #tpu.memory_space<vmem>>, %arg5: memref<1x32xf32, #tpu.memory_space<vmem>>, %arg6: memref<8x32xf32, #tpu.memory_space<vmem>>, %arg7: memref<8x32xf32, #tpu.memory_space<vmem>>) attributes {dimension_semantics = [#tpu.dimension_semantics<parallel>, #tpu.dimension_semantics<arbitrary>], iteration_bounds = array<i64: 2, 4>, scalar_prefetch = 0 : i64, scratch_operands = 1 : i64, tpu.core_type = #tpu.core_type<tc>, window_params = [{transform_indices = @transform_0, window_bounds = array<i64: 8, 32>}, {transform_indices = @transform_1, window_bounds = array<i64: 1, 32, 48>}, {transform_indices = @transform_2, window_bounds = array<i64: 1, 16, 32>}, {pipeline_mode = #tpu.pipeline_mode<synchronous>, transform_indices = @transform_3, window_bounds = array<i64: 1, 32>}, {transform_indices = @transform_4, window_bounds = array<i64: 8, 32>}]} {
    %c0_i32 = arith.constant 0 : i32
    %0 = arith.cmpi eq, %arg1, %c0_i32 : i32
    %1 = arith.extui %0 : i1 to i32
    %c0_i32_0 = arith.constant 0 : i32
    %2 = arith.cmpi ne, %1, %c0_i32_0 : i32
    scf.if %2 {
      %cst_18 = arith.constant 0.000000e+00 : f32
      %40 = vector.broadcast %cst_18 : f32 to vector<8x32xf32>
      %c0_19 = arith.constant 0 : index
      %c0_20 = arith.constant 0 : index
      %41 = vector.load %arg7[%c0_19, %c0_20] : memref<8x32xf32, #tpu.memory_space<vmem>>, vector<8x32xf32>
      tpu.vector_store %arg7[%c0_19, %c0_20], %40 {strides = array<i32>} : memref<8x32xf32, #tpu.memory_space<vmem>>, vector<8x32xf32>,
    } else {
    }
    %c0 = arith.constant 0 : index
    %c0_1 = arith.constant 0 : index
    %3 = vector.load %arg2[%c0, %c0_1] : memref<8x32xbf16, #tpu.memory_space<vmem>>, vector<8x32xbf16>
    %c0_2 = arith.constant 0 : index
    %c0_3 = arith.constant 0 : index
    %c0_4 = arith.constant 0 : index
    %4 = vector.load %arg3[%c0_2, %c0_3, %c0_4] : memref<1x32x48xbf16, #tpu.memory_space<vmem>>, vector<1x32x48xbf16>
    %5 = vector.shape_cast %4 : vector<1x32x48xbf16> to vector<32x48xbf16>
    %cst = arith.constant dense<0.000000e+00> : vector<8x48xf32>
    %6 = tpu.matmul %3, %5, %cst {dimension_numbers = #tpu.dot_dimension_numbers<[1], [0], [0], [1], [0, 0, 1, 1], [], []>} : vector<8x32xbf16>, vector<32x48xbf16>, vector<8x48xf32> -> vector<8x48xf32>
    %7 = vector.extract_strided_slice %6 {offsets = [0, 0], sizes = [8, 16], strides = [1, 1]} : vector<8x48xf32> to vector<8x16xf32>
    %8 = vector.extract_strided_slice %6 {offsets = [0, 16], sizes = [8, 16], strides = [1, 1]} : vector<8x48xf32> to vector<8x16xf32>
    %9 = vector.extract_strided_slice %6 {offsets = [0, 32], sizes = [8, 16], strides = [1, 1]} : vector<8x48xf32> to vector<8x16xf32>
    %10 = vector.shape_cast %7 : vector<8x16xf32> to vector<1x8x16xf32>
    %11 = arith.truncf %10 : vector<1x8x16xf32> to vector<1x8x16xbf16>
    %12 = vector.shape_cast %8 : vector<8x16xf32> to vector<1x8x16xf32>
    %13 = arith.truncf %12 : vector<1x8x16xf32> to vector<1x8x16xbf16>
    %14 = vector.shape_cast %9 : vector<8x16xf32> to vector<1x8x16xf32>
    %15 = arith.truncf %14 : vector<1x8x16xf32> to vector<1x8x16xbf16>
    "tpu.trace_start"() <{level = 10 : i32, message = "bid,bjd->bij"}> : () -> ()
    %cst_5 = arith.constant dense<0.000000e+00> : vector<1x8x8xf32>
    %16 = tpu.matmul %11, %13, %cst_5 {dimension_numbers = #tpu.dot_dimension_numbers<[2], [2], [1], [1], [0, 0, 0, 1, 1, 1], [0], [0]>} : vector<1x8x16xbf16>, vector<1x8x16xbf16>, vector<1x8x8xf32> -> vector<1x8x8xf32>
    "tpu.trace_stop"() : () -> ()
    %cst_6 = arith.constant dense<0xFF800000> : vector<1x8xf32>
    %17 = vector.multi_reduction <maximumf>, %16, %cst_6 [2] : vector<1x8x8xf32> to vector<1x8xf32>
    %18 = vector.shape_cast %17 : vector<1x8xf32> to vector<1x8x1xf32>
    %19 = vector.broadcast %18 : vector<1x8x1xf32> to vector<1x8x8xf32>
    %20 = arith.subf %16, %19 : vector<1x8x8xf32>
    %21 = math.exp %20 : vector<1x8x8xf32>
    %cst_7 = arith.constant dense<0.000000e+00> : vector<1x8xf32>
    %22 = vector.multi_reduction <add>, %21, %cst_7 [2] : vector<1x8x8xf32> to vector<1x8xf32>
    %23 = vector.shape_cast %22 : vector<1x8xf32> to vector<1x8x1xf32>
    %24 = arith.truncf %21 : vector<1x8x8xf32> to vector<1x8x8xbf16>
    "tpu.trace_start"() <{level = 10 : i32, message = "bij,bjd->bid"}> : () -> ()
    %cst_8 = arith.constant dense<0.000000e+00> : vector<1x8x16xf32>
    %25 = tpu.matmul %24, %15, %cst_8 {dimension_numbers = #tpu.dot_dimension_numbers<[2], [1], [1], [2], [0, 0, 0, 1, 1, 2], [0], [0]>} : vector<1x8x8xbf16>, vector<1x8x16xbf16>, vector<1x8x16xf32> -> vector<1x8x16xf32>
    "tpu.trace_stop"() : () -> ()
    %26 = tpu.reciprocal %23 {approx = true} : vector<1x8x1xf32> -> vector<1x8x1xf32>
    %27 = vector.broadcast %26 : vector<1x8x1xf32> to vector<1x8x16xf32>
    %28 = arith.mulf %25, %27 : vector<1x8x16xf32>
    %c0_9 = arith.constant 0 : index
    %c0_10 = arith.constant 0 : index
    %29 = vector.load %arg7[%c0_9, %c0_10] : memref<8x32xf32, #tpu.memory_space<vmem>>, vector<8x32xf32>
    %30 = vector.shape_cast %28 : vector<1x8x16xf32> to vector<8x16xf32>
    %31 = arith.truncf %30 : vector<8x16xf32> to vector<8x16xbf16>
    %c0_11 = arith.constant 0 : index
    %c0_12 = arith.constant 0 : index
    %c0_13 = arith.constant 0 : index
    %32 = vector.load %arg4[%c0_11, %c0_12, %c0_13] : memref<1x16x32xbf16, #tpu.memory_space<vmem>>, vector<1x16x32xbf16>
    %33 = vector.shape_cast %32 : vector<1x16x32xbf16> to vector<16x32xbf16>
    %cst_14 = arith.constant dense<0.000000e+00> : vector<8x32xf32>
    %34 = tpu.matmul %31, %33, %cst_14 {dimension_numbers = #tpu.dot_dimension_numbers<[1], [0], [0], [1], [0, 0, 1, 1], [], []>} : vector<8x16xbf16>, vector<16x32xbf16>, vector<8x32xf32> -> vector<8x32xf32>
    %35 = arith.addf %29, %34 : vector<8x32xf32>
    %c0_15 = arith.constant 0 : index
    %c0_16 = arith.constant 0 : index
    %36 = vector.load %arg7[%c0_15, %c0_16] : memref<8x32xf32, #tpu.memory_space<vmem>>, vector<8x32xf32>
    tpu.vector_store %arg7[%c0_15, %c0_16], %35 {strides = array<i32>} : memref<8x32xf32, #tpu.memory_space<vmem>>, vector<8x32xf32>,
    %c3_i32 = arith.constant 3 : i32
    %37 = arith.cmpi eq, %arg1, %c3_i32 : i32
    %38 = arith.extui %37 : i1 to i32
    %c0_i32_17 = arith.constant 0 : i32
    %39 = arith.cmpi ne, %38, %c0_i32_17 : i32
    scf.if %39 {
      %c0_18 = arith.constant 0 : index
      %c0_19 = arith.constant 0 : index
      %40 = vector.load %arg7[%c0_18, %c0_19] : memref<8x32xf32, #tpu.memory_space<vmem>>, vector<8x32xf32>
      %c0_20 = arith.constant 0 : index
      %c0_21 = arith.constant 0 : index
      %41 = vector.load %arg5[%c0_20, %c0_21] : memref<1x32xf32, #tpu.memory_space<vmem>>, vector<1x32xf32>
      %42 = vector.broadcast %41 : vector<1x32xf32> to vector<8x32xf32>
      %43 = arith.addf %40, %42 : vector<8x32xf32>
      %c0_22 = arith.constant 0 : index
      %c0_23 = arith.constant 0 : index
      %44 = vector.load %arg6[%c0_22, %c0_23] : memref<8x32xf32, #tpu.memory_space<vmem>>, vector<8x32xf32>
      tpu.vector_store %arg6[%c0_22, %c0_23], %43 {strides = array<i32>} : memref<8x32xf32, #tpu.memory_space<vmem>>, vector<8x32xf32>,
    } else {
    }
    return
  }
  func.func @transform_0(%arg0: i32, %arg1: i32) -> (i32, i32) {
    %c0_i32 = arith.constant 0 : i32
    %c0_i32_0 = arith.constant 0 : i32
    return %arg0, %c0_i32 : i32, i32
  }
  func.func @transform_1(%arg0: i32, %arg1: i32) -> (i32, i32, i32) {
    %c0_i32 = arith.constant 0 : i32
    %c0_i32_0 = arith.constant 0 : i32
    %c0_i32_1 = arith.constant 0 : i32
    return %arg1, %c0_i32, %c0_i32_0 : i32, i32, i32
  }
  func.func @transform_2(%arg0: i32, %arg1: i32) -> (i32, i32, i32) {
    %c0_i32 = arith.constant 0 : i32
    %c0_i32_0 = arith.constant 0 : i32
    %c0_i32_1 = arith.constant 0 : i32
    return %arg1, %c0_i32, %c0_i32_0 : i32, i32, i32
  }
  func.func @transform_3(%arg0: i32, %arg1: i32) -> (i32, i32) {
    %c0_i32 = arith.constant 0 : i32
    %c0_i32_0 = arith.constant 0 : i32
    %c0_i32_1 = arith.constant 0 : i32
    return %c0_i32, %c0_i32_0 : i32, i32
  }
  func.func @transform_4(%arg0: i32, %arg1: i32) -> (i32, i32) {
    %c0_i32 = arith.constant 0 : i32
    %c0_i32_0 = arith.constant 0 : i32
    return %arg0, %c0_i32 : i32, i32
  }
}

</mosaic_0001>

<bundles_post_ra>
// kernel: tpu_custom_call.1
= control target key start
LH: loop header
LB: loop body
LE: loop exit
PB: predicated region body
PF: predicated region fallthrough
CT: control target
= control target key end

     0   :  { %s1517_s0 = inlined_call_operand.hbm [shape: bf16[16,32], index: 0, kind: input, shape index: {}]   ;;  %s1518_s1 = inlined_call_operand.hbm [shape: bf16[4,32,48], index: 1, kind: input, shape index: {}]   ;;  %s1519_s2 = inlined_call_operand.hbm [shape: bf16[4,16,32], index: 2, kind: input, shape index: {}]   ;;  %s1520_s3 = inlined_call_operand.vmem [shape: f32[1,32], index: 3, kind: input, shape index: {}]   ;;  %s1521_s4 = inlined_call_operand.hbm [shape: f32[16,32], index: 4, kind: output, shape index: {}]  }
   0x1   :  { %1535 = sst [smem:[#allocation21_spill]] %s1518_s1 }
   0x2   :  { %1536 = sst [smem:[#allocation22_spill]] %s1520_s3 }
   0x3   :  { %1537 = sst [smem:[#allocation23_spill]] %s1521_s4 }
   0x4   :  { %9 = vsyncpa [#allocation4], 0 }
   0x5   :  { %11 = vsyncpa [#allocation4 + $0x1], 0 }
   0x6   :  { %12 = vsyncpa [#allocation7], 0 }
   0x7   :  { %14 = vsyncpa [#allocation7 + $0x1], 0 }
   0x8   :  { %15 = vsyncpa [#allocation5], 0 }
   0x9   :  { %17 = vsyncpa [#allocation5 + $0x1], 0  ;;  %s1138_s15 = smov 0   ;;  %s1140_s16 = smov 0  }
   0xa   :  { %s1142_s17 = smov 0   ;;  %s1144_s18 = smov 0  }
   0xb   :  { %s1146_s19 = smov 0   ;;  %s1148_s20 = smov 0  }
   0xc   :  { %s1150_s21 = smov 0   ;;  %s1152_s22 = smov 0  }
   0xd   :  { %s1154_s23 = smov 0   ;;  %s1156_s24 = smov 0  }
   0xe   :  { %s1158_s25 = smov 0  }
   0xf LB: > { %1538 = sst [smem:[#allocation13_spill]] %s1068_s17  ;;  %s32_s26 = sadd.s32 1, %s1092_s23  ;;  %s1100_s25 = sphi %s1158_s25, %s23_s25   ;;  %s1096_s24 = sphi %s1156_s24, %s1575_s24   ;;  %s1092_s23 = sphi %s1154_s23, %s1581_s23   ;;  %s1088_s22 = sphi %s1152_s22, %s1573_s22   ;;  %s1084_s21 = sphi %s1150_s21, %s1580_s21   ;;  %s1080_s20 = sphi %s1148_s20, %s1572_s20   ;;  %s1076_s19 = sphi %s1146_s19, %s1579_s19   ;;  %s1072_s18 = sphi %s1144_s18, %s1578_s18   ;;  %s1068_s17 = sphi %s1142_s17, %s1570_s17   ;;  %s1064_s16 = sphi %s1140_s16, %s1577_s16   ;;  %s1060_s15 = sphi %s1138_s15, %s1576_s15  }
  0x10   : > { %1539 = sst [smem:[#allocation14_spill]] %s1080_s20  ;;  %p50_p0 = scmp.eq.s32.totalorder %s1100_s25, 0 }
  0x11   : > { %1540 = sst [smem:[#allocation15_spill]] %s1088_s22  ;;  %s68_s27 = sadd.s32 1, %s1068_s17 }
  0x12   : > { %1541 = sst [smem:[#allocation16_spill]] %s1096_s24  ;;  %p75_p1 = scmp.ne.s32.totalorder %s1068_s17, %s1064_s16 }
  0x13   : > { %p1522_p4 = scmp.lt.s32.totalorder %s1100_s25, 8  ;;  %s199_s28 = sand.u32 1, %s1100_s25  }
  0x14   : > { %p77_p3 = por %p75_p1, %p50_p0  ;;  %s201_s29 = sand.u32 1, %s1068_s17  }
  0x15   : > { %s696_s30 = sshll.u32 %s201_s29, 4  ;;  %s721_s5 = sshll.u32 %s1092_s23, 8 }
  0x16   : > { %s1542_s1 = sld [smem:[#allocation21_spill]]  ;;  %s203_s9 = scalar_lea.vmem [#allocation6], %s696_s30 }
  0x17   : > { %s210_s10 = sshll.u32 %s203_s9, 4  ;;  %p1215_p5 = pnand %p1522_p4, %p77_p3  ;;  %s1211_s10 = int_to_ptr.vmem [resolvable:$true] %s210_s10 }
  0x18   : > { %s1219_s12 = sshll.u32 %s201_s29, 3  ;;  %s1221_s13 = scalar_lea.sflag [#allocation7], %s199_s28 }
  0x19   : > { %p1527_p7 = pneg %p1215_p5 }
  0x1c   : > { %s1209_s8 = scalar_lea.hbm %s1542_s1, %s721_s5  ;;  %s889_s6 = scalar_lea.hbm %s1542_s1, 1024 }
  0x1d   : > { %s884_s14 = scalar_lea.hbm %s1209_s8, 256  ;;  %p890_p10 = scmp.lt.u32.totalorder %s1209_s8, %s1542_s1 }
  0x1e   : > { %p885_p6 = scmp.ne.s32.totalorder %s1209_s8, %s884_s14  ;;  %p891_p11 = scmp.lt.u32.totalorder %s889_s6, %s884_s14 }
  0x1f   : > { %p893_p13 = scmp.lt.u32.totalorder %s884_s14, %s1209_s8 }
  0x20   : > { %p887_p8 = pnand %p1527_p7, %p885_p6  ;;  %p892_p12 = por %p891_p11, %p890_p10 }
  0x22   : > { %p888_p9 = pneg %p887_p8  ;;  %p894_p1 = por %p893_p13, %p892_p12 }
  0x24   : > { %p895_p3 = pnand %p894_p1, %p888_p9 }
  0x26   : > { %898 = shalt.err (!%p895_p3)
}
  0x27   : > { %s899_s28 = scalar_lea.vmem %s1211_s10, 256  ;;  %s1102_s29 = smov [#allocation6]  }
  0x28   : > { %p900_p6 = scmp.ne.s32.totalorder %s1211_s10, %s899_s28  ;;  %s904_s30 = sshll.u32 %s1102_s29, 4  ;;  %s905_s30 = int_to_ptr.vmem [resolvable:$false] %s904_s30 }
  0x29   : > { %s906_s5 = scalar_lea.vmem %s905_s30, 512  ;;  %p907_p2 = scmp.lt.s32.totalorder %s1211_s10, %s905_s30 }
  0x2a   : > { %p902_p8 = pnand %p900_p6, %p1527_p7  ;;  %p908_p10 = scmp.lt.s32.totalorder %s906_s5, %s899_s28 }
  0x2c   : > { %p903_p4 = pneg %p902_p8  ;;  %p909_p11 = por %p908_p10, %p907_p2 }
  0x2e   : > { %p910_p12 = pnand %p909_p11, %p903_p4 }
  0x30   : > { %913 = shalt.err (!%p910_p12)
}
  0x31   : > { %s1523_s14 = smov 64   ;;  %s1524_s6 = smov 4  }
  0x32   : > { %772 = dma.hbm_to_vmem [thread:$0]  (!%p1215_p5), %s1209_s8, 256, %s1211_s10, %s1221_s13, %s1523_s14, %s1523_s14, %s1524_s6  }
  0x33   : > { %p702_p2 = scmp.ge.s32.totalorder %s1100_s25, 1  ;;  %s224_s7 = scalar_lea.vmem [#allocation8], %s1219_s12 }
  0x34   : > { %s1254_s9 = sshll.u32 %s224_s7, 4  ;;  %p239_p4 = scmp.lt.s32.totalorder %s1100_s25, 9  ;;  %s1382_s9 = int_to_ptr.vmem [resolvable:$true] %s1254_s9 }
  0x35   : > { %s1262_s29 = sadd.s32 4294967295, %s1100_s25   ;;  %s691_s8 = sadd.s32 4294967294, %s1100_s25  }
  0x36   : > { %p1257_p9 = pnand %p702_p2, %p239_p4  ;;  %p33_p13 = scmp.ge.s32.totalorder %s32_s26, 4 }
  0x37   : > { %s35_s10 = sadd.s32 1, %s1096_s24  ;;  %s42_s12 = sadd.s32 1, %s1080_s20 }
  0x38   : > { %s1544_s28 = scalar_select %p1257_p9, 1, 0 }
  0x39   : > { %s1583_s26 = smov (%p33_p13, %s32_s26), 0  ;;  %s1585_s10 = smov (!%p33_p13, %s35_s10), %s1096_s24 }
  0x3a   : > { %1545 = sst [smem:[#allocation17_spill]] %s1583_s26  ;;  %p49_p1 = scmp.ne.s32.totalorder %s1080_s20, %s1076_s19 }
  0x3b   : > { %p55_p3 = scmp.ne.s32.totalorder %s1076_s19, %s1072_s18  ;;  %p37_p6 = scmp.ge.s32.totalorder %s1585_s10, 2 }
  0x3c   : > { %p56_p8 = scmp.eq.s32.totalorder %s1262_s29, 0  ;;  %p1284_p10 = por %p50_p0, %p49_p1 }
  0x3d   : > { %s65_s5 = ssub.s32 %s1092_s23, %s1583_s26  ;;  %s1587_s10 = smov (%p37_p6, %s1585_s10), 0 }
  0x3e   : > { %1547 = sst [smem:[#allocation18_spill]] %s1587_s10  ;;  %p1295_p11 = por %p56_p8, %p55_p3 }
  0x3f   : > { %p66_p12 = scmp.eq.s32.totalorder %s65_s5, 0  ;;  %s39_s14 = ssub.s32 %s1096_s24, %s1587_s10 }
  0x40   : > { %s1548_s7 = scalar_select %p1295_p11, 1, 0 }
  0x41   : > { %p1549_p2 = scmp.ne.s32.totalorder %s1064_s16, %s1060_s15  ;;  %p40_p0 = scmp.eq.s32.totalorder %s39_s14, 0 }
  0x42   : > { %p152_p13 = scmp.eq.s32.totalorder %s1262_s29, 7  ;;  %p158_p7 = scmp.eq.s32.totalorder %s691_s8, 7 }
  0x43   : > { %p1304_p4 = por %p1549_p2, %p56_p8  ;;  %s181_s5 = sand.u32 1, %s1080_s20  }
  0x44   : > { %s1312_s1 = scalar_select %p66_p12, %s1068_s17, %s68_s27  }
  0x45   : > { %s1550_s6 = scalar_select %p1304_p4, 1, 0 }
  0x46   : > { %1551 = sst [smem:[#allocation19_spill]] %s1312_s1  ;;  %p1320_p6 = por %p152_p13, %p49_p1 }
  0x47   : > { %s1315_s26 = scalar_select %p40_p0, %s1080_s20, %s42_s12  }
  0x48   : > { %s1553_s4 = scalar_select %p1320_p6, 1, 0 }
  0x49   : > { %1552 = sst [smem:[#allocation20_spill]] %s1315_s26  ;;  %s695_s15 = sshll.u32 %s1096_s24, 6 }
  0x4a   : > { %p1329_p8 = por %p158_p7, %p55_p3  ;;  %s694_s14 = sshll.u32 %s181_s5, 2 }
  0x4b   : > { %s1336_s27 = scalar_lea.hbm %s1517_s0, %s695_s15  ;;  %p1555_p12 = scmp.lt.s32.totalorder %s1100_s25, 8 }
  0x4c   : > { %s1554_s10 = scalar_select %p1329_p8, 1, 0 }
  0x4d   : > { %p1342_p1 = pnand %p1555_p12, %p1284_p10  ;;  %s185_s12 = scalar_lea.vmem [#allocation3], %s694_s14 }
  0x4e   : > { %s192_s24 = sshll.u32 %s185_s12, 4  ;;  %s722_s26 = sshll.u32 %s1092_s23, 7  ;;  %s1347_s24 = int_to_ptr.vmem [resolvable:$true] %s192_s24 }
  0x4f   : > { %s182_s3 = scalar_lea.sflag [#allocation4], %s181_s5  ;;  %s914_s22 = scalar_lea.hbm %s1336_s27, 64 }
  0x50   : > { %p915_p7 = scmp.ne.s32.totalorder %s1336_s27, %s914_s22  ;;  %p916_p3 = pneg %p1342_p1 }
  0x51   : > { %s919_s20 = scalar_lea.hbm %s1517_s0, 128  ;;  %p920_p10 = scmp.lt.u32.totalorder %s1336_s27, %s1517_s0 }
  0x52   : > { %p917_p2 = pnand %p916_p3, %p915_p7  ;;  %p921_p13 = scmp.lt.u32.totalorder %s919_s20, %s914_s22 }
  0x53   : > { %p923_p8 = scmp.lt.u32.totalorder %s914_s22, %s1336_s27 }
  0x54   : > { %p918_p0 = pneg %p917_p2  ;;  %p922_p12 = por %p921_p13, %p920_p10 }
  0x56   : > { %p924_p6 = por %p923_p8, %p922_p12 }
  0x58   : > { %p925_p4 = pnand %p924_p6, %p918_p0 }
  0x5a   : > { %928 = shalt.err (!%p925_p4)
}
  0x5b   : > { %s929_s5 = scalar_lea.vmem %s1347_s24, 64  ;;  %s1105_s14 = smov [#allocation3]  }
  0x5c   : > { %p930_p7 = scmp.ne.s32.totalorder %s1347_s24, %s929_s5  ;;  %s934_s12 = sshll.u32 %s1105_s14, 4  ;;  %s935_s12 = int_to_ptr.vmem [resolvable:$false] %s934_s12 }
  0x5d   : > { %s936_s1 = scalar_lea.vmem %s935_s12, 128  ;;  %p937_p9 = scmp.lt.s32.totalorder %s1347_s24, %s935_s12 }
  0x5e   : > { %p932_p2 = pnand %p930_p7, %p916_p3  ;;  %p938_p10 = scmp.lt.s32.totalorder %s936_s1, %s929_s5 }
  0x60   : > { %p933_p11 = pneg %p932_p2  ;;  %p939_p13 = por %p938_p10, %p937_p9 }
  0x62   : > { %p940_p8 = pnand %p939_p13, %p933_p11 }
  0x64   : > { %943 = shalt.err (!%p940_p8)
}
  0x65   : > { %769 = dma.hbm_to_vmem [thread:$0]  (!%p1342_p1), %s1336_s27, 64, %s1347_s24, %s182_s3  }
  0x66   : > { %s1379_s22 = scalar_lea.hbm %s1519_s2, %s722_s26  ;;  %p1557_p11 = pneg %p1215_p5 }
  0x67   : > { %s944_s30 = scalar_lea.hbm %s1379_s22, 128  ;;  %s949_s27 = scalar_lea.hbm %s1519_s2, 512 }
  0x68   : > { %p945_p9 = scmp.ne.s32.totalorder %s1379_s22, %s944_s30  ;;  %p950_p1 = scmp.lt.u32.totalorder %s1379_s22, %s1519_s2 }
  0x69   : > { %p951_p3 = scmp.lt.u32.totalorder %s949_s27, %s944_s30  ;;  %p953_p12 = scmp.lt.u32.totalorder %s944_s30, %s1379_s22 }
  0x6a   : > { %p947_p4 = pnand %p945_p9, %p1557_p11 }
  0x6b   : > { %p952_p0 = por %p951_p3, %p950_p1 }
  0x6c   : > { %p948_p6 = pneg %p947_p4 }
  0x6d   : > { %p954_p7 = por %p953_p12, %p952_p0 }
  0x6f   : > { %p955_p2 = pnand %p954_p7, %p948_p6 }
  0x71   : > { %958 = shalt.err (!%p955_p2)
}
  0x72   : > { %s959_s26 = scalar_lea.vmem %s1382_s9, 128  ;;  %p1558_p13 = pmov %p1557_p11 }
  0x73   : > { %p960_p10 = scmp.ne.s32.totalorder %s1382_s9, %s959_s26  ;;  %s1106_s5 = smov [#allocation8]  }
  0x74   : > { %s964_s14 = sshll.u32 %s1106_s5, 4  ;;  %s965_s14 = int_to_ptr.vmem [resolvable:$false] %s964_s14 }
  0x75   : > { %p962_p8 = pnand %p960_p10, %p1558_p13  ;;  %s966_s12 = scalar_lea.vmem %s965_s14, 256 }
  0x76   : > { %p967_p11 = scmp.lt.s32.totalorder %s1382_s9, %s965_s14  ;;  %p968_p4 = scmp.lt.s32.totalorder %s966_s12, %s959_s26 }
  0x77   : > { %p963_p9 = pneg %p962_p8 }
  0x78   : > { %p969_p1 = por %p968_p4, %p967_p11 }
  0x7a   : > { %p970_p3 = pnand %p969_p1, %p963_p9 }
  0x7c   : > { %973 = shalt.err (!%p970_p3)
}
  0x7d   : > { %s1559_s1 = smov 4   ;;  %s1560_s17 = smov 64  }
  0x7e   : > { %775 = dma.hbm_to_vmem [thread:$0]  (!%p1215_p5), %s1379_s22, 128, %s1382_s9, %s1221_s13, %s1560_s17, %s1560_s17, %s1559_s1  }
  0x7f   : > { %p1561_p6 = scmp.ne.s32.totalorder %s1544_s28, 0 }
  0x80   : > { %s1414_s20 = sand.u32 (!%p1561_p6), 1, %s1076_s19   ;;  %p1562_p0 = scmp.ne.s32.totalorder (!%p1561_p6), %s1548_s7, 0 }
  0x81   : > { %243 = sbr.rel (%p1561_p6) target bundleno = 1339 (0x53b), region = 36  ;;  %s703_s30 = sshll.u32 (!%p1561_p6), %s1414_s20, 2 }
  0x82   : > { %s246_s8 = scalar_lea.sflag (!%p1561_p6), [#allocation4], %s1414_s20  ;;  %s1418_s24 = scalar_lea.vmem (!%p1561_p6), [#allocation3], %s703_s30 }
  0x88   : > { %1047 = dma.done.wait (%p1562_p0), %s246_s8, 64  }
  0x89   : > { %1049 = vsyncadd (%p1562_p0), %s246_s8, 4294967232  ;;  %s254_s11 = sand.u32 1, %s1262_s29   ;;  %s256_s13 = sand.u32 1, %s1064_s16  }
  0x8a   : > { %s704_s9 = sshll.u32 %s256_s13, 4  ;;  %s255_s28 = scalar_lea.sflag [#allocation7], %s254_s11 }
  0x8b   : > { %s258_s22 = scalar_lea.vmem [#allocation6], %s704_s9  ;;  %p1563_p5 = scmp.ne.s32.totalorder %s1550_s6, 0 }
  0x8d   : > { %1051 = dma.done.wait (%p1563_p5), %s255_s28, 384  }
  0x8e   : > { %1053 = vsyncadd (%p1563_p5), %s255_s28, 4294966912  ;;  %s1430_s27 = sshll.u32 %s256_s13, 3  ;;  %s706_s3 = sshll.u32 %s1414_s20, 3 }
  0x8f   : > { %s267_s7 = scalar_lea.vmem [#allocation8], %s1430_s27  ;;  %s1434_s15 = scalar_lea.vmem [#allocation9], %s706_s3 }
  0x90   : > { %p707_p12 = scmp.ne.s32.totalorder %s1084_s21, 0 }
  0x91   : > { %vm307_vm0 = vcmask (!%p707_p12), 261120   ;;  %v1107_v0 = vmov (!%p707_p12), 0.0  }
  0x92   : > { %306 = sbr.rel (%p707_p12) target bundleno = 153 (0x99), region = 52  ;;  %308 = vst.msk [vmem:[#allocation2] sm:$0xff] (!%p707_p12), %vm307_vm0, %v1107_v0 }
  0x99 PF: > { %v877_v1 = vld [vmem:[%s258_s22] sm:$0xff]   ;;  %v1108_v2 = vmov 0.0   ;;  %v878_v3 = vld [vmem:[%s258_s22 + $0x8] sm:$0xff]   ;;  %vm1109_vm1 = vmmov 0   ;;  %vm326_vm2 = vcmask 261120   ;;  %s1110_s6 = smov 96  }
  0x9a   : > { %732 = vmatprep.subr.bf16.mxu0 %v1108_v2  ;;  %740 = vmatprep.subr.bf16.mxu1 %v1108_v2  ;;  %v309_v4 = vld [vmem:[%s1418_s24] sm:$0xf]  ;;  %s1111_s29 = smov 112   ;;  %vm437_vm3 = vcmask 1043456   ;;  %vm374_vm4 = vcmask 130048   ;;  %vm421_vm5 = vcmask 64512  }
  0x9b   : > { %733 = vmatpush3.bf16.msra.mxu0 %v877_v1  ;;  %736 = vmatprep.mubr.msk.bf16.mxu0 %vm1109_vm1, %v1108_v2  ;;  %v879_v25 = vld [vmem:[%s267_s7] sm:$0xff]   ;;  %v483_v34 = vld [vmem:[#allocation2] sm:$0xff]  ;;  %p715_p7 = scmp.ne.s32.totalorder %s1084_s21, 3 }
  0x9c   : > { %734 = vmatprep.subr.bf16.mxu0 %v1108_v2  ;;  %742 = vmatprep.mubr.msk.bf16.mxu1 %vm1109_vm1, %v1108_v2  ;;  %s1564_s14 = sld [smem:[#allocation22_spill]] (!%p715_p7) }
  0x9f   : > { %735 = vmatpush3.bf16.msra.mxu0 %v878_v3 }
  0xa0   : > { %746 = vmatprep.subr.bf16.mxu0 %v1108_v2 }
  0xa2   : > { %737 = vmatmul.mubr.msk.bf16.vlgmr.msra.gmra.mrb[0].mxu0 %vm326_vm2, %v309_v4  ;;  %v716_v41 = vld [vmem:[%s1564_s14] ss:$0 sm:$0xff] (!%p715_p7) }
  0xa3   : > { %748 = vmatprep.mubr.msk.bf16.mxu0 %vm1109_vm1, %v1108_v2 }
 0x175   : > { %v364_v5 = vpop.f32.mrb[0].mxu0 }
 0x176   : > { %v370_v6 = vpack.c.bf16 %v364_v5, %v364_v5  ;;  %v738_v7 = vpop.f32.mrb[1].mxu0 }
 0x177   : > { %v367_v8 = vpop.f32.mrb[2].mxu0 }
 0x178   : > { %432 = vrot.lane.b32.xlu1 %v370_v6, %s1110_s6  ;;  %372 = vrot.lane.b32.xlu0 %v370_v6, %s1111_s29  ;;  %v739_v9 = vpop.f32.mrb[3].mxu0 }
 0x1ea   : > { %v433_v10 = vpop.permute.xlu1 %432  ;;  %v373_v11 = vpop.permute.xlu0 %372 }
 0x1eb   : > { %v439_v12 = vsel %vm437_vm3, %v433_v10, 0  ;;  %v379_v13 = vsel %vm374_vm4, %v373_v11, 0 }
 0x1ec   : > { %741 = vmatpush3.bf16.xpose.msra.mxu1 %v379_v13  ;;  %747 = vmatpush3.bf16.msra.mxu0 %v439_v12 }
 0x1ed   : > { %752 = vmatprep.subr.bf16.mxu1 %v1108_v2 }
 0x1f3   : > { %743 = vmatmul.mubr.msk.bf16.vlgmr.msra.gmra.mrb[0].mxu1 %vm374_vm4, %v370_v6 }
 0x1f4   : > { %754 = vmatprep.mubr.msk.bf16.mxu1 %vm1109_vm1, %v1108_v2  ;;  %753 = vmatpush3.bf16.msra.mxu1 %v879_v25 }
 0x2c6   : > { %v415_v14 = vpop.f32.mrb[0].mxu1 }
 0x2c7   : > { %v744_v15 = vpop.f32.mrb[1].mxu1  ;;  %v422_v16 = vsel %vm421_vm5, %v415_v14, -inf }
 0x2c8   : > { %423 = vmax.xlane.f32.xlu0 %v422_v16  ;;  %v418_v17 = vpop.f32.mrb[2].mxu1 }
 0x2c9   : > { %v745_v18 = vpop.f32.mrb[3].mxu1 }
 0x355   : > { %v424_v19 = vpop.xlane.xlu0 %423 }
 0x356   : > { %v425_v20 = vsub.f32 %v415_v14, %v424_v19 }
 0x358   : > { %v426_v21 = vmul.f32 1.442695, %v425_v20 }
 0x35a   : > { %880 = vpow2.f32 %v426_v21 }
 0x364   : > { %v881_v22 = vpop.eup %880 }
 0x365   : > { %v428_v23 = vsel %vm421_vm5, %v881_v22, 0.0  ;;  %v431_v24 = vpack.c.bf16 %v881_v22, %v881_v22 }
 0x366   : > { %429 = vadd.xlane.f32.xlu1 %v428_v23 }
 0x367   : > { %749 = vmatmul.mubr.msk.bf16.vlgmr.msra.gmra.mrb[4].mxu0 %vm421_vm5, %v431_v24 }
 0x3f3   : > { %v430_v26 = vpop.xlane.xlu1 %429 }
 0x3f4   : > { %882 = vrcp.f32 %v430_v26 }
 0x3fe   : > { %v883_v27 = vpop.eup %882 }
 0x43a   : > { %v475_v28 = vpop.f32.mrb[4].mxu0 }
 0x43b   : > { %v482_v29 = vmul.f32 %v883_v27, %v475_v28  ;;  %v750_v30 = vpop.f32.mrb[5].mxu0 }
 0x43c   : > { %v478_v31 = vpop.f32.mrb[6].mxu0 }
 0x43d   : > { %v484_v32 = vpack.c.bf16 %v482_v29, %v482_v29  ;;  %v751_v33 = vpop.f32.mrb[7].mxu0 }
 0x43f   : > { %755 = vmatmul.mubr.msk.bf16.vlgmr.msra.gmra.mrb[4].mxu1 %vm374_vm4, %v484_v32 }
 0x50f   : > { %541 = sbr.rel (%p715_p7) target bundleno = 1312 (0x520), region = 56 }
 0x512   : > { %v530_v35 = vpop.f32.mrb[4].mxu1 }
 0x513   : > { %v536_v36 = vadd.f32 %v530_v35, %v483_v34  ;;  %v756_v37 = vpop.f32.mrb[5].mxu1 }
 0x514   : > { %v533_v38 = vpop.f32.mrb[6].mxu1 }
 0x515   : > { %537 = vst.msk [vmem:[#allocation2] sm:$0xff] %vm326_vm2, %v536_v36  ;;  %v757_v39 = vpop.f32.mrb[7].mxu1 }
 0x51c   : > { %v542_v40 = vld [vmem:[#allocation2] sm:$0xff] }
 0x51d   : > { %v550_v42 = vadd.f32 %v716_v41, %v542_v40 }
 0x51f   : > { %551 = vst.msk [vmem:[%s1434_s15] sm:$0xff] %vm326_vm2, %v550_v42 }
 0x520 PF: > { %s1565_s12 = sld [smem:[#allocation15_spill]]  ;;  %s566_s24 = sshll.u32 %s1434_s15, 4  ;;  %s567_s24 = int_to_ptr.vmem [resolvable:$true] %s566_s24 }
 0x521   : > { %s1566_s8 = sld [smem:[#allocation23_spill]]  ;;  %s553_s11 = scalar_lea.sflag [#allocation5], %s1414_s20 }
 0x522   : > { %s974_s13 = scalar_lea.vmem %s567_s24, 128  ;;  %p1567_p10 = scmp.ne.s32.totalorder %s1553_s4, 0 }
 0x523   : > { %p975_p2 = scmp.ne.s32.totalorder %s567_s24, %s974_s13  ;;  %s1112_s9 = smov [#allocation9]  }
 0x524   : > { %s978_s28 = sshll.u32 %s1112_s9, 4  ;;  %s979_s28 = int_to_ptr.vmem [resolvable:$false] %s978_s28 }
 0x525   : > { %p976_p13 = pnand %p975_p2, %p1567_p10  ;;  %s980_s22 = scalar_lea.vmem %s979_s28, 256 }
 0x526   : > { %s718_s1 = sshll.u32 %s1565_s12, 7  ;;  %p981_p9 = scmp.lt.s32.totalorder %s567_s24, %s979_s28 }
 0x527   : > { %s1459_s21 = scalar_lea.hbm %s1566_s8, %s718_s1  ;;  %p977_p8 = pneg %p976_p13 }
 0x528   : > { %p982_p11 = scmp.lt.s32.totalorder %s980_s22, %s974_s13 }
 0x52a   : > { %p983_p4 = por %p982_p11, %p981_p9 }
 0x52c   : > { %p984_p1 = pnand %p983_p4, %p977_p8 }
 0x52e   : > { %987 = shalt.err (!%p984_p1)
}
 0x52f   : > { %s988_s20 = scalar_lea.hbm %s1459_s21, 128  ;;  %s992_s7 = scalar_lea.hbm %s1566_s8, 256 }
 0x530   : > { %p989_p3 = scmp.ne.s32.totalorder %s1459_s21, %s988_s20  ;;  %p993_p5 = scmp.lt.u32.totalorder %s1459_s21, %s1566_s8 }
 0x531   : > { %p994_p12 = scmp.lt.u32.totalorder %s992_s7, %s988_s20  ;;  %p996_p2 = scmp.lt.u32.totalorder %s988_s20, %s1459_s21 }
 0x532   : > { %p990_p6 = pnand %p989_p3, %p1567_p10 }
 0x533   : > { %p995_p7 = por %p994_p12, %p993_p5 }
 0x534   : > { %p991_p0 = pneg %p990_p6 }
 0x535   : > { %p997_p13 = por %p996_p2, %p995_p7 }
 0x537   : > { %p998_p8 = pnand %p997_p13, %p991_p0 }
 0x539   : > { %1001 = shalt.err (!%p998_p8)
}
 0x53a   : > { %764 = dma.vmem_to_hbm [thread:$0]  (%p1567_p10), %s567_s24, 128, %s1459_s21, %s553_s11  }
 0x53b PF: > { %p781_p9 = scmp.ge.s32.totalorder %s1100_s25, 2  ;;  %s578_s29 = sand.u32 1, %s1072_s18  }
 0x53c   : > { %p1568_p11 = scmp.ne.s32.totalorder %s1554_s10, 0  ;;  %s579_s26 = scalar_lea.sflag [#allocation5], %s578_s29 }
 0x53e   : > { %p777_p4 = pnand %p781_p9, %p1568_p11 }
 0x540   : > { %1055 = dma.done.wait (!%p777_p4), %s579_s26, 128  }
 0x541   : > { %1057 = vsyncadd (!%p777_p4), %s579_s26, 4294967168  ;;  %s23_s25 = sadd.s32 1, %s1100_s25   ;;  %s1569_s5 = sld [smem:[#allocation13_spill]] }
 0x542   : > { %p20_p1 = scmp.ge.s32.totalorder %s23_s25, 10   ;;  %s1570_s17 = sld [smem:[#allocation19_spill]] }
 0x543   : > { %s1571_s4 = sld [smem:[#allocation14_spill]]  ;;  %s1572_s20 = sld [smem:[#allocation20_spill]] }
 0x544   : > { %s1573_s22 = sld [smem:[#allocation16_spill]]  ;;  %s1574_s14 = sld [smem:[#allocation17_spill]] }
 0x545   : > { %s1575_s24 = sld [smem:[#allocation18_spill]]  ;;  %s1576_s15 = smov %s1064_s16 }
 0x546   : > { %s1578_s18 = smov %s1076_s19  ;;  %s1580_s21 = smov %s1092_s23 }
 0x547   : > { %s1577_s16 = smov %s1569_s5  ;;  %22 = sbr.rel (!%p20_p1) target bundleno = 15 (0xf), region = 113 }
 0x549   : > { %s1579_s19 = smov %s1571_s4 }
 0x54a   : > { %s1581_s23 = smov %s1574_s14 }
 0x54e   :  { %584 = vsyncpa [#allocation4], 1 }
 0x54f   :  { %586 = vsyncpa [#allocation4 + $0x1], 1 }
 0x550   :  { %587 = vsyncpa [#allocation7], 1 }
 0x551   :  { %589 = vsyncpa [#allocation7 + $0x1], 1 }
 0x552   :  { %590 = vsyncpa [#allocation5], 1 }
 0x553   :  { %592 = vsyncpa [#allocation5 + $0x1], 1 }

</bundles_post_ra>
